<compile_context>
chip_gen: v7x
topology: tpu7x:2x2x1
jax: 0.10.0
libtpu: 0.0.40
codegen_flags: <defaults>
</compile_context>

<pallas_src>
import functools

import jax
import jax.numpy as jnp
from jax import lax
from jax.experimental import pallas as pl
from jax.experimental.pallas import tpu as pltpu


def _round_up(v, m):
    return ((v + m - 1) // m) * m


def _reflect_src(i, pad, n_up, u):
    """ORIGINAL-resolution source index for padded-upsampled coordinate i."""
    t = i - pad
    if t < 0:
        t = -t                          # reflect (no edge repeat), top/left
    elif t >= n_up:
        t = 2 * (n_up - 1) - t          # reflect, bottom/right
    return t // u                       # nearest-neighbour upsample folded in


def _runs(idx):
    """Compress a static index list into maximal (start, length) +1-runs."""
    runs = []
    start, length = idx[0], 1
    for v in idx[1:]:
        if v == start + length:
            length += 1
        else:
            runs.append((start, length))
            start, length = v, 1
    runs.append((start, length))
    return runs


def _pick_row_tile(OH, OW, m_max=2048):
    """Largest TR dividing OH with TR*OW a multiple of 128 and TR*OW <= m_max."""
    best = None
    for tr in range(1, OH + 1):
        if OH % tr:
            continue
        m = tr * OW
        if m <= m_max and m % 128 == 0:
            best = tr
    if best is None:   # fallback: largest tile under the cap (masked stores OK)
        for tr in range(1, OH + 1):
            if OH % tr == 0 and tr * OW <= m_max:
                best = tr
    return best if best is not None else OH


def _conv_kernel(x_ref, w_ref, b_ref, o_ref, *, rmap, cmap, KH, KW, s,
                 OW, OH, TR, OC, mxu_dtype):
    # x_ref : (1, C, H, W)   original-resolution NCHW input, one batch element
    # w_ref : (OCp, K)       weights, rows = out channel, cols = (kh, kw, c)
    # b_ref : (OCp, 1)       bias (f32)
    # o_ref : (1, OC, OH*OW) lane-dense output (already NCHW-flattened)
    C = x_ref.shape[1]
    R = OH // TR
    M = TR * OW

    # ---- column stage: per kw, the original columns every output column needs
    #      (static contiguous-run slices; 1-2 pieces for u == s / u == 1).
    xcols = []
    for kw in range(KW):
        col_idx = [cmap[ow * s + kw] for ow in range(OW)]
        parts = [x_ref[0, :, :, a:a + l] for (a, l) in _runs(col_idx)]
        xcols.append(parts[0] if len(parts) == 1
                     else jnp.concatenate(parts, axis=2))          # (C, H, OW)

    # ---- row blocks: static in-kernel loop (R == 1 at the example shapes)
    for rb in range(R):
        pieces = []
        for kh in range(KH):
            row_idx = [rmap[(rb * TR + t) * s + kh] for t in range(TR)]
            row_runs = _runs(row_idx)
            for kw in range(KW):
                xc = xcols[kw]
                parts = [xc[:, a:a + l, :] for (a, l) in row_runs]
                win = (parts[0] if len(parts) == 1
                       else jnp.concatenate(parts, axis=1))        # (C, TR, OW)
                pieces.append(win.reshape(C, M))                   # (C, M)
        a_t = jnp.concatenate(pieces, axis=0)                      # (K, M)
        if mxu_dtype is not None:
            a_t = a_t.astype(mxu_dtype)

        # single fused MXU matmul: (OCp, K) x (K, M) -> (OCp, M), pixels on lanes
        out_t = lax.dot_general(w_ref[...], a_t, (((1,), (0,)), ((), ())),
                                preferred_element_type=jnp.float32)
        out_t = out_t + b_ref[...]                                 # bias, once
        o_ref[0, :, pl.ds(rb * M, M)] = out_t[:OC, :].astype(o_ref.dtype)


def conv_layer_forward(x_nchw, weight_oihw, bias, *, kernel_size, stride,
                       upsample=None, mxu_dtype=None):
    """Forward pass matching the PyTorch ConvLayer, NCHW in / NCHW out."""
    N, C, H, W = x_nchw.shape
    OC = weight_oihw.shape[0]
    KH = KW = kernel_size
    s = int(stride)
    u = 1 if upsample is None else int(upsample)
    p = kernel_size // 2

    Hu, Wu = H * u, W * u
    assert p < Hu and p < Wu, "reflection pad must be < (upsampled) image size"
    Hp, Wp = Hu + 2 * p, Wu + 2 * p
    OH = (Hp - KH) // s + 1
    OW = (Wp - KW) // s + 1

    # Static maps: padded-upsampled coordinate -> original source index
    # (reflection padding + nearest upsample folded into tap indexing).
    rmap = tuple(_reflect_src(i, p, Hu, u) for i in range(Hp))
    cmap = tuple(_reflect_src(j, p, Wu, u) for j in range(Wp))

    TR = _pick_row_tile(OH, OW)
    K = KH * KW * C
    OCp = _round_up(OC, 8)             # f32 sublane quantum only, not 128

    # (OC, IC, KH, KW) -> (OC, KH, KW, IC) -> (OC, K); pad OC to sublane quantum.
    w_flat = jnp.transpose(weight_oihw, (0, 2, 3, 1)).reshape(OC, K)
    w_dtype = x_nchw.dtype if mxu_dtype is None else mxu_dtype
    w_pad = jnp.pad(w_flat, ((0, OCp - OC), (0, 0))).astype(w_dtype)
    b_pad = jnp.pad(bias, (0, OCp - OC)).reshape(OCp, 1).astype(jnp.float32)

    kernel = functools.partial(
        _conv_kernel, rmap=rmap, cmap=cmap, KH=KH, KW=KW, s=s,
        OW=OW, OH=OH, TR=TR, OC=OC, mxu_dtype=mxu_dtype)

    out = pl.pallas_call(
        kernel,
        out_shape=jax.ShapeDtypeStruct((N, OC, OH * OW), x_nchw.dtype),
        grid_spec=pltpu.PrefetchScalarGridSpec(
            num_scalar_prefetch=0,
            grid=(N,),
            in_specs=[
                # native channel-planar NCHW input, one batch element per step
                pl.BlockSpec((1, C, H, W), lambda n: (n, 0, 0, 0)),
                pl.BlockSpec((OCp, K), lambda n: (0, 0)),
                pl.BlockSpec((OCp, 1), lambda n: (0, 0)),
            ],
            out_specs=pl.BlockSpec((1, OC, OH * OW), lambda n: (n, 0, 0)),
        ),
        compiler_params=pltpu.CompilerParams(
            dimension_semantics=("parallel",)),
    )(x_nchw, w_pad, b_pad)

    return out.reshape(N, OC, OH, OW)      # already NCHW; reshape is free


def _reference(x_nchw, weight_oihw, bias, *, kernel_size, stride, upsample):
    """Pure-JAX reference (lax conv) with identical semantics."""
    x = jnp.transpose(x_nchw, (0, 2, 3, 1))
    if upsample is not None:
        x = jnp.repeat(x, upsample, axis=1)
        x = jnp.repeat(x, upsample, axis=2)
    p = kernel_size // 2
    x_pad = jnp.pad(x, ((0, 0), (p, p), (p, p), (0, 0)), mode="reflect")
    w_hwio = jnp.transpose(weight_oihw, (2, 3, 1, 0))
    out = lax.conv_general_dilated(
        x_pad, w_hwio, window_strides=(stride, stride), padding="VALID",
        dimension_numbers=("NHWC", "HWIO", "NHWC"))
    out = out + bias[None, None, None, :]
    return jnp.transpose(out, (0, 3, 1, 2))


if __name__ == "__main__":
    # Module config (small, consistent with ConvLayer's __init__):
    in_channels, out_channels = 4, 8
    kernel_size, stride, upsample = 3, 2, 2
    batch, spatial = 2, 16

    key = jax.random.PRNGKey(0)
    kx, kw, kb = jax.random.split(key, 3)
    x = jax.random.normal(kx, (batch, in_channels, spatial, spatial),
                          dtype=jnp.float32)
    # Deterministic synthetic parameters (PyTorch Conv2d weight shape: OIHW).
    weight = jax.random.normal(
        kw, (out_channels, in_channels, kernel_size, kernel_size),
        dtype=jnp.float32) * 0.1
    bias = jax.random.normal(kb, (out_channels,), dtype=jnp.float32) * 0.1

    out = conv_layer_forward(x, weight, bias, kernel_size=kernel_size,
                             stride=stride, upsample=upsample)
    out = jax.block_until_ready(out)

    ref = _reference(x, weight, bias, kernel_size=kernel_size, stride=stride,
                     upsample=upsample)
    assert out.shape == ref.shape, (out.shape, ref.shape)
    assert jnp.allclose(out, ref, atol=1e-4, rtol=1e-4), float(
        jnp.max(jnp.abs(out - ref)))

    print("KERNEL_OK")
</pallas_src>

<mosaic_0001>
module attributes {stable_mosaic.version = 11 : i64} {
  func.func @_conv_kernel(%arg0: i32, %arg1: memref<1x4x16x16xf32, #tpu.memory_space<vmem>>, %arg2: memref<8x36xf32, #tpu.memory_space<vmem>>, %arg3: memref<8x1xf32, #tpu.memory_space<vmem>>, %arg4: memref<1x8x256xf32, #tpu.memory_space<vmem>>) attributes {dimension_semantics = [#tpu.dimension_semantics<parallel>], iteration_bounds = array<i64: 2>, scalar_prefetch = 0 : i64, scratch_operands = 0 : i64, tpu.core_type = #tpu.core_type<tc>, window_params = [{transform_indices = @transform_0, window_bounds = array<i64: 1, 4, 16, 16>}, {pipeline_mode = #tpu.pipeline_mode<synchronous>, transform_indices = @transform_1, window_bounds = array<i64: 8, 36>}, {pipeline_mode = #tpu.pipeline_mode<synchronous>, transform_indices = @transform_2, window_bounds = array<i64: 8, 1>}, {transform_indices = @transform_3, window_bounds = array<i64: 1, 8, 256>}]} {
    %c0 = arith.constant 0 : index
    %c0_0 = arith.constant 0 : index
    %c0_1 = arith.constant 0 : index
    %c0_2 = arith.constant 0 : index
    %0 = vector.load %arg1[%c0, %c0_0, %c0_1, %c0_2] : memref<1x4x16x16xf32, #tpu.memory_space<vmem>>, vector<1x4x16x1xf32>
    %1 = vector.shape_cast %0 : vector<1x4x16x1xf32> to vector<4x16x1xf32>
    %c0_3 = arith.constant 0 : index
    %c0_4 = arith.constant 0 : index
    %c0_5 = arith.constant 0 : index
    %c0_6 = arith.constant 0 : index
    %2 = vector.load %arg1[%c0_3, %c0_4, %c0_5, %c0_6] : memref<1x4x16x16xf32, #tpu.memory_space<vmem>>, vector<1x4x16x15xf32>
    %3 = vector.shape_cast %2 : vector<1x4x16x15xf32> to vector<4x16x15xf32>
    %4 = tpu.concatenate %1, %3 in 2 : vector<4x16x1xf32>, vector<4x16x15xf32> -> vector<4x16x16xf32>
    %c0_7 = arith.constant 0 : index
    %c0_8 = arith.constant 0 : index
    %c0_9 = arith.constant 0 : index
    %c0_10 = arith.constant 0 : index
    %5 = vector.load %arg1[%c0_7, %c0_8, %c0_9, %c0_10] : memref<1x4x16x16xf32, #tpu.memory_space<vmem>>, vector<1x4x16x16xf32>
    %6 = vector.shape_cast %5 : vector<1x4x16x16xf32> to vector<4x16x16xf32>
    %c0_11 = arith.constant 0 : index
    %c0_12 = arith.constant 0 : index
    %c0_13 = arith.constant 0 : index
    %c0_14 = arith.constant 0 : index
    %7 = vector.load %arg1[%c0_11, %c0_12, %c0_13, %c0_14] : memref<1x4x16x16xf32, #tpu.memory_space<vmem>>, vector<1x4x16x16xf32>
    %8 = vector.shape_cast %7 : vector<1x4x16x16xf32> to vector<4x16x16xf32>
    %9 = vector.extract_strided_slice %4 {offsets = [0, 0, 0], sizes = [4, 1, 16], strides = [1, 1, 1]} : vector<4x16x16xf32> to vector<4x1x16xf32>
    %10 = vector.extract_strided_slice %4 {offsets = [0, 0, 0], sizes = [4, 15, 16], strides = [1, 1, 1]} : vector<4x16x16xf32> to vector<4x15x16xf32>
    %11 = tpu.concatenate %9, %10 in 1 : vector<4x1x16xf32>, vector<4x15x16xf32> -> vector<4x16x16xf32>
    %12 = vector.shape_cast %11 : vector<4x16x16xf32> to vector<4x256xf32>
    %13 = vector.extract_strided_slice %6 {offsets = [0, 0, 0], sizes = [4, 1, 16], strides = [1, 1, 1]} : vector<4x16x16xf32> to vector<4x1x16xf32>
    %14 = vector.extract_strided_slice %6 {offsets = [0, 0, 0], sizes = [4, 15, 16], strides = [1, 1, 1]} : vector<4x16x16xf32> to vector<4x15x16xf32>
    %15 = tpu.concatenate %13, %14 in 1 : vector<4x1x16xf32>, vector<4x15x16xf32> -> vector<4x16x16xf32>
    %16 = vector.shape_cast %15 : vector<4x16x16xf32> to vector<4x256xf32>
    %17 = vector.extract_strided_slice %8 {offsets = [0, 0, 0], sizes = [4, 1, 16], strides = [1, 1, 1]} : vector<4x16x16xf32> to vector<4x1x16xf32>
    %18 = vector.extract_strided_slice %8 {offsets = [0, 0, 0], sizes = [4, 15, 16], strides = [1, 1, 1]} : vector<4x16x16xf32> to vector<4x15x16xf32>
    %19 = tpu.concatenate %17, %18 in 1 : vector<4x1x16xf32>, vector<4x15x16xf32> -> vector<4x16x16xf32>
    %20 = vector.shape_cast %19 : vector<4x16x16xf32> to vector<4x256xf32>
    %21 = vector.shape_cast %4 : vector<4x16x16xf32> to vector<4x256xf32>
    %22 = vector.shape_cast %6 : vector<4x16x16xf32> to vector<4x256xf32>
    %23 = vector.shape_cast %8 : vector<4x16x16xf32> to vector<4x256xf32>
    %24 = vector.shape_cast %4 : vector<4x16x16xf32> to vector<4x256xf32>
    %25 = vector.shape_cast %6 : vector<4x16x16xf32> to vector<4x256xf32>
    %26 = vector.shape_cast %8 : vector<4x16x16xf32> to vector<4x256xf32>
    %27 = tpu.concatenate %12, %16, %20, %21, %22, %23, %24, %25, %26 in 0 : vector<4x256xf32>, vector<4x256xf32>, vector<4x256xf32>, vector<4x256xf32>, vector<4x256xf32>, vector<4x256xf32>, vector<4x256xf32>, vector<4x256xf32>, vector<4x256xf32> -> vector<36x256xf32>
    %c0_15 = arith.constant 0 : index
    %c0_16 = arith.constant 0 : index
    %28 = vector.load %arg2[%c0_15, %c0_16] : memref<8x36xf32, #tpu.memory_space<vmem>>, vector<8x36xf32>
    %cst = arith.constant dense<0.000000e+00> : vector<8x256xf32>
    %29 = tpu.matmul %28, %27, %cst {dimension_numbers = #tpu.dot_dimension_numbers<[1], [0], [0], [1], [0, 0, 1, 1], [], []>} : vector<8x36xf32>, vector<36x256xf32>, vector<8x256xf32> -> vector<8x256xf32>
    %c0_17 = arith.constant 0 : index
    %c0_18 = arith.constant 0 : index
    %30 = vector.load %arg3[%c0_17, %c0_18] : memref<8x1xf32, #tpu.memory_space<vmem>>, vector<8x1xf32>
    %31 = vector.broadcast %30 : vector<8x1xf32> to vector<8x256xf32>
    %32 = arith.addf %29, %31 : vector<8x256xf32>
    %c0_19 = arith.constant 0 : index
    %c0_20 = arith.constant 0 : index
    %c0_21 = arith.constant 0 : index
    %33 = vector.load %arg4[%c0_19, %c0_20, %c0_21] : memref<1x8x256xf32, #tpu.memory_space<vmem>>, vector<1x8x256xf32>
    %34 = vector.shape_cast %33 : vector<1x8x256xf32> to vector<8x256xf32>
    %35 = vector.shape_cast %32 : vector<8x256xf32> to vector<1x8x256xf32>
    tpu.vector_store %arg4[%c0_19, %c0_20, %c0_21], %35 {strides = array<i32>} : memref<1x8x256xf32, #tpu.memory_space<vmem>>, vector<1x8x256xf32>,
    return
  }
  func.func @transform_0(%arg0: i32) -> (i32, i32, i32, i32) {
    %c0_i32 = arith.constant 0 : i32
    %c0_i32_0 = arith.constant 0 : i32
    %c0_i32_1 = arith.constant 0 : i32
    %c0_i32_2 = arith.constant 0 : i32
    return %arg0, %c0_i32, %c0_i32_0, %c0_i32_1 : i32, i32, i32, i32
  }
  func.func @transform_1(%arg0: i32) -> (i32, i32) {
    %c0_i32 = arith.constant 0 : i32
    %c0_i32_0 = arith.constant 0 : i32
    %c0_i32_1 = arith.constant 0 : i32
    return %c0_i32, %c0_i32_0 : i32, i32
  }
  func.func @transform_2(%arg0: i32) -> (i32, i32) {
    %c0_i32 = arith.constant 0 : i32
    %c0_i32_0 = arith.constant 0 : i32
    %c0_i32_1 = arith.constant 0 : i32
    return %c0_i32, %c0_i32_0 : i32, i32
  }
  func.func @transform_3(%arg0: i32) -> (i32, i32, i32) {
    %c0_i32 = arith.constant 0 : i32
    %c0_i32_0 = arith.constant 0 : i32
    %c0_i32_1 = arith.constant 0 : i32
    return %arg0, %c0_i32, %c0_i32_0 : i32, i32, i32
  }
}

</mosaic_0001>

<bundles_post_ra>
// kernel: tpu_custom_call.1
= control target key start
LH: loop header
LB: loop body
LE: loop exit
PB: predicated region body
PF: predicated region fallthrough
CT: control target
= control target key end

     0   :  { %8 = vsyncpa [#allocation3], 0  ;;  %s2277_s0 = inlined_call_operand.hbm [shape: f32[2,4,16,16], index: 0, kind: input, shape index: {}]   ;;  %s2278_s1 = inlined_call_operand.vmem [shape: f32[8,36], index: 1, kind: input, shape index: {}]   ;;  %s2279_s2 = inlined_call_operand.vmem [shape: f32[8,1], index: 2, kind: input, shape index: {}]   ;;  %s2280_s3 = inlined_call_operand.hbm [shape: f32[2,8,256], index: 3, kind: output, shape index: {}]  }
   0x1   :  { %10 = vsyncpa [#allocation3 + $0x1], 0 }
   0x2   :  { %11 = vsyncpa [#allocation4], 0 }
   0x3   :  { %13 = vsyncpa [#allocation4 + $0x1], 0  ;;  %s1654_s12 = smov 0   ;;  %s1656_s13 = smov 0  }
   0x4   :  { %s1658_s14 = smov 0   ;;  %s1660_s15 = smov 0  }
   0x5 LB: > { %s1675_s16 = sadd.s32 4294967295, %s1616_s15   ;;  %s1326_s17 = sadd.s32 4294967294, %s1616_s15   ;;  %s1616_s15 = sphi %s1660_s15, %s2293_s15   ;;  %s1612_s14 = sphi %s1658_s14, %s2292_s14   ;;  %s1608_s13 = sphi %s1656_s13, %s2291_s13   ;;  %s1604_s12 = sphi %s1654_s12, %s2290_s12  }
   0x6   : > { %s1679_s18 = sadd.s32 1, %s1616_s15   ;;  %s26_s19 = sadd.s32 1, %s1612_s14 }
   0x7   : > { %s23_s20 = ssub.s32 %s1616_s15, %s1679_s18  ;;  %p33_p0 = scmp.ne.s32.totalorder %s1612_s14, %s1608_s13 }
   0x8   : > { %p24_p1 = scmp.eq.s32.totalorder %s23_s20, 0  ;;  %p34_p2 = scmp.eq.s32.totalorder %s1616_s15, 0 }
   0x9   : > { %p39_p3 = scmp.ne.s32.totalorder %s1608_s13, %s1604_s12  ;;  %p40_p4 = scmp.eq.s32.totalorder %s1675_s16, 0 }
   0xa   : > { %s1691_s21 = scalar_select %p24_p1, %s1612_s14, %s26_s19  }
   0xb   : > { %p1693_p5 = por %p34_p2, %p33_p0  ;;  %p1697_p6 = por %p40_p4, %p39_p3 }
   0xc   : > { %p105_p7 = scmp.eq.s32.totalorder %s1675_s16, 1  ;;  %p111_p8 = scmp.eq.s32.totalorder %s1326_s17, 1 }
   0xd   : > { %p1365_p10 = scmp.lt.s32.totalorder %s1616_s15, 2  ;;  %s137_s26 = sand.u32 1, %s1612_s14  }
   0xe   : > { %p1704_p11 = por %p105_p7, %p33_p0  ;;  %p1708_p12 = por %p111_p8, %p39_p3 }
   0xf   : > { %s1343_s27 = sshll.u32 %s1616_s15, 10  ;;  %s1329_s28 = sshll.u32 %s137_s26, 6 }
  0x10   : > { %s2284_s24 = scalar_select %p1704_p11, 1, 0 }
  0x11   : > { %s2285_s25 = scalar_select %p1708_p12, 1, 0 }
  0x12   : > { %s1717_s4 = scalar_lea.hbm %s2277_s0, %s1343_s27  ;;  %s141_s5 = scalar_lea.vmem [#allocation2], %s1329_s28 }
  0x13   : > { %s148_s6 = sshll.u32 %s141_s5, 4  ;;  %p1721_p13 = pnand %p1365_p10, %p1693_p5  ;;  %s1725_s6 = int_to_ptr.vmem [resolvable:$true] %s148_s6 }
  0x14   : > { %s1727_s8 = scalar_lea.sflag [#allocation3], %s137_s26  ;;  %s1520_s9 = scalar_lea.hbm %s1717_s4, 1024 }
  0x15   : > { %p1521_p0 = scmp.ne.s32.totalorder %s1717_s4, %s1520_s9  ;;  %p1522_p1 = pneg %p1721_p13 }
  0x16   : > { %s1525_s17 = scalar_lea.hbm %s2277_s0, 2048  ;;  %p1526_p4 = scmp.lt.u32.totalorder %s1717_s4, %s2277_s0 }
  0x17   : > { %p1523_p2 = pnand %p1522_p1, %p1521_p0  ;;  %p1527_p5 = scmp.lt.u32.totalorder %s1525_s17, %s1520_s9 }
  0x18   : > { %p1529_p8 = scmp.lt.u32.totalorder %s1520_s9, %s1717_s4 }
  0x19   : > { %p1524_p3 = pneg %p1523_p2  ;;  %p1528_p7 = por %p1527_p5, %p1526_p4 }
  0x1b   : > { %p1530_p10 = por %p1529_p8, %p1528_p7 }
  0x1d   : > { %p1531_p9 = pnand %p1530_p10, %p1524_p3 }
  0x1f   : > { %1534 = shalt.err (!%p1531_p9)
}
  0x20   : > { %s1535_s22 = scalar_lea.vmem %s1725_s6, 1024  ;;  %s1618_s26 = smov [#allocation2]  }
  0x21   : > { %p1536_p0 = scmp.ne.s32.totalorder %s1725_s6, %s1535_s22  ;;  %s1540_s27 = sshll.u32 %s1618_s26, 4  ;;  %s1541_s27 = int_to_ptr.vmem [resolvable:$false] %s1540_s27 }
  0x22   : > { %s1542_s28 = scalar_lea.vmem %s1541_s27, 2048  ;;  %p1543_p11 = scmp.lt.s32.totalorder %s1725_s6, %s1541_s27 }
  0x23   : > { %p1538_p2 = pnand %p1536_p0, %p1522_p1  ;;  %p1544_p4 = scmp.lt.s32.totalorder %s1542_s28, %s1535_s22 }
  0x25   : > { %p1539_p12 = pneg %p1538_p2  ;;  %p1545_p5 = por %p1544_p4, %p1543_p11 }
  0x27   : > { %p1546_p7 = pnand %p1545_p5, %p1539_p12 }
  0x29   : > { %1549 = shalt.err (!%p1546_p7)
}
  0x2a   : > { %s1619_s29 = smov 128   ;;  %s1620_s30 = smov 8  }
  0x2b   : > { %1360 = dma.hbm_to_vmem [thread:$0]  (!%p1721_p13), %s1717_s4, 1024, %s1725_s6, %s1727_s8, %s1619_s29, %s1619_s29, %s1620_s30  }
  0x2c   : > { %p1332_p9 = scmp.ge.s32.totalorder %s1616_s15, 1  ;;  %p156_p1 = scmp.lt.s32.totalorder %s1616_s15, 3 }
  0x2e   : > { %p157_p3 = pnand %p1332_p9, %p156_p1 }
  0x2f   : > { %s1758_s5 = sand.u32 (!%p157_p3), 1, %s1608_s13  }
  0x30   : > { %160 = sbr.rel (%p157_p3) target bundleno = 596 (0x254), region = 32  ;;  %s1333_s9 = sshll.u32 (!%p157_p3), %s1758_s5, 6 }
  0x31   : > { %s163_s10 = scalar_lea.sflag (!%p157_p3), [#allocation3], %s1758_s5  ;;  %s166_s11 = scalar_lea.vmem (!%p157_p3), [#allocation2], %s1333_s9 }
  0x37   : > { %1595 = dma.done.wait (%p1697_p6), %s163_s10, 1024  }
  0x38   : > { %1597 = vsyncadd (%p1697_p6), %s163_s10, 4294966272  ;;  %v276_v0 = vlaneseq  ;;  %v1621_v1 = vmov 1983009808   ;;  %v1622_v3 = vmov 0.0   ;;  %v1623_v6 = vmov 1934713408  }
  0x39   : > { %v274_v2 = vunpack.c.l.s4 %v1621_v1  ;;  %1232 = vmatprep.mubr.f32.mxu0 %v1622_v3  ;;  %v306_v7 = vunpack.c.l.s4 %v1623_v6  ;;  %v1767_v8 = vld [vmem:[%s166_s11 + $0x10] sm:$0xff]  ;;  %v1769_v9 = vld [vmem:[%s166_s11] sm:$0xff]  ;;  %v1771_v10 = vld [vmem:[%s166_s11 + $0x18] sm:$0xff]  ;;  %s1624_s23 = smov 1   ;;  %s1625_s4 = smov 16   ;;  %vm246_vm0 = vcmask 1040384  }
  0x3a   : > { %v277_v5 = vshrl.u32 %v276_v0, 7  ;;  %209 = vrot.lane.b32.xlu1 %v1767_v8, %s1624_s23  ;;  %205 = vrot.lane.b32.xlu0 %v1769_v9, %s1624_s23  ;;  %v1779_v13 = vld [vmem:[%s166_s11 + $0x8] sm:$0xff]  ;;  %v1783_v15 = vld [vmem:[%s166_s11 + $0x20] sm:$0xff]  ;;  %s1626_s6 = smov 32   ;;  %s1627_s7 = smov 48   ;;  %v484_v58 = vrot.slane %v1769_v9, 7 }
  0x3b   : > { %v275_v4 = vunpack.c.0.s8 %v274_v2  ;;  %v307_v12 = vunpack.c.0.s8 %v306_v7  ;;  %v1781_v14 = vld [vmem:[%s166_s11 + $0x28] sm:$0xff]  ;;  %v1785_v16 = vld [vmem:[%s166_s11 + $0x38] sm:$0xff]  ;;  %v1787_v17 = vld [vmem:[%s166_s11 + $0x30] sm:$0xff]  ;;  %v920_v20 = vcombine.low %v1769_v9, %v1783_v15  ;;  %v921_v39 = vcombine.high %v1769_v9, %v1783_v15  ;;  %s1628_s8 = smov 64   ;;  %s1629_s17 = smov 80  }
  0x3c   : > { %v988_v18 = vcombine.low %v1779_v13, %v1781_v14  ;;  %v1004_v19 = vcombine.low %v1771_v10, %v1785_v16  ;;  %v936_v21 = vcombine.low %v1767_v8, %v1787_v17  ;;  %v989_v28 = vcombine.high %v1779_v13, %v1781_v14  ;;  %s1630_s19 = smov 96   ;;  %s1631_s20 = smov 112  }
  0x3d   : > { %v1773_v11 = vsub.s32 %v275_v4, %v277_v5  ;;  %v1797_v22 = vsub.s32 %v307_v12, %v277_v5  ;;  %v1005_v29 = vcombine.high %v1771_v10, %v1785_v16  ;;  %v937_v40 = vcombine.high %v1767_v8, %v1787_v17  ;;  %s1334_s29 = sshll.u32 %s1758_s5, 4  ;;  %s1344_s30 = sshll.u32 %s1675_s16, 8 }
  0x3e   : > { %211 = vrot.lane.b32.xlu1 %v1771_v10, %s1624_s23  ;;  %207 = vrot.lane.b32.xlu0 %v1779_v13, %s1624_s23  ;;  %v485_v56 = vrot.slane %v1779_v13, 7  ;;  %v491_v57 = vrot.slane %v1781_v14, 7  ;;  %v490_v59 = vrot.slane %v1783_v15, 7  ;;  %v488_v60 = vrot.slane %v1771_v10, 7  ;;  %s188_s9 = scalar_lea.vmem [#allocation5], %s1334_s29  ;;  %p2287_p11 = scmp.ne.s32.totalorder %s2284_s24, 0 }
  0x3f   : > { %v996_v23 = vrot.slane %v988_v18, %v1773_v11  ;;  %v1012_v24 = vrot.slane %v1004_v19, %v1773_v11  ;;  %v928_v25 = vrot.slane %v920_v20, %v1773_v11  ;;  %v944_v26 = vrot.slane %v936_v21, %v1773_v11  ;;  %s1256_s10 = sshll.u32 %s188_s9, 4  ;;  %s2235_s10 = int_to_ptr.vmem [resolvable:$true] %s1256_s10 }
  0x40   : > { %v1003_v34 = vrot.slane %v989_v28, %v1773_v11  ;;  %v1019_v35 = vrot.slane %v1005_v29, %v1773_v11  ;;  %v1840_v44 = vrot.slane %v921_v39, %v1773_v11  ;;  %v1843_v45 = vrot.slane %v937_v40, %v1773_v11  ;;  %s1550_s16 = scalar_lea.vmem %s2235_s10, 256 }
  0x41   : > { %v1020_v27 = vcombine.low %v996_v23, %v1012_v24  ;;  %v1021_v31 = vcombine.high %v996_v23, %v1012_v24  ;;  %v952_v32 = vcombine.low %v928_v25, %v944_v26  ;;  %v953_v33 = vcombine.high %v928_v25, %v944_v26  ;;  %p1551_p6 = scmp.ne.s32.totalorder %s2235_s10, %s1550_s16 }
  0x42   : > { %215 = vrot.lane.b32.xlu1 %v1781_v14, %s1624_s23  ;;  %213 = vrot.lane.b32.xlu0 %v1783_v15, %s1624_s23  ;;  %v1036_v43 = vcombine.low %v1003_v34, %v1019_v35  ;;  %v968_v50 = vcombine.low %v1840_v44, %v1843_v45  ;;  %v1037_v51 = vcombine.high %v1003_v34, %v1019_v35  ;;  %v494_v61 = vrot.slane %v1785_v16, 7 }
  0x43   : > { %v1816_v30 = vrot.slane %v1020_v27, %v1797_v22  ;;  %v1035_v37 = vrot.slane %v1021_v31, %v1797_v22  ;;  %v1828_v38 = vrot.slane %v952_v32, %v1797_v22  ;;  %v967_v42 = vrot.slane %v953_v33, %v1797_v22  ;;  %p1552_p12 = pnand %p1551_p6, %p2287_p11 }
  0x44   : > { %v1044_v48 = vrot.slane %v1036_v43, %v1797_v22  ;;  %v976_v52 = vrot.slane %v968_v50, %v1797_v22  ;;  %v1859_v53 = vrot.slane %v1037_v51, %v1797_v22  ;;  %v969_v55 = vcombine.high %v1840_v44, %v1843_v45 }
  0x45   : > { %v1052_v36 = vcombine.high %v1816_v30, %v1622_v3  ;;  %v984_v41 = vcombine.high %v1828_v38, %v1622_v3  ;;  %v1053_v46 = vcombine.high %v1035_v37, %v1622_v3  ;;  %v985_v47 = vcombine.high %v967_v42, %v1622_v3  ;;  %p1553_p13 = pneg %p1552_p12 }
  0x46   : > { %219 = vrot.lane.b32.xlu1 %v1785_v16, %s1624_s23  ;;  %217 = vrot.lane.b32.xlu0 %v1787_v17, %s1624_s23  ;;  %v1054_v49 = vcombine.high %v1044_v48, %v1622_v3  ;;  %v986_v54 = vcombine.high %v976_v52, %v1622_v3  ;;  %v487_v0 = vrot.slane %v1767_v8, 7  ;;  %v493_v1 = vrot.slane %v1787_v17, 7 }
  0x47   : > { %v486_v2 = vsel %vm246_vm0, %v484_v58, %v485_v56  ;;  %v492_v4 = vsel %vm246_vm0, %v490_v59, %v491_v57  ;;  %v504_v18 = vsel %vm246_vm0, %v1769_v9, %v484_v58  ;;  %v506_v20 = vsel %vm246_vm0, %v1783_v15, %v490_v59 }
  0x48   : > { %v489_v7 = vsel %vm246_vm0, %v487_v0, %v488_v60  ;;  %v495_v12 = vsel %vm246_vm0, %v493_v1, %v494_v61  ;;  %v505_v19 = vsel %vm246_vm0, %v1767_v8, %v487_v0  ;;  %v507_v21 = vsel %vm246_vm0, %v1787_v17, %v493_v1 }
  0x49   : > { %v577_v23 = vcombine.high %v486_v2, %v492_v4  ;;  %v593_v24 = vcombine.high %v489_v7, %v495_v12  ;;  %v576_v25 = vcombine.low %v486_v2, %v492_v4  ;;  %v592_v28 = vcombine.low %v489_v7, %v495_v12 }
  0x4a   : > { %1085 = vrot.lane.b32.xlu0 %v1052_v36, %s1625_s4  ;;  %1089 = vrot.lane.b32.xlu1 %v1035_v37, %s1626_s6  ;;  %v509_v29 = vcombine.high %v504_v18, %v506_v20  ;;  %v525_v31 = vcombine.high %v505_v19, %v507_v21  ;;  %v508_v32 = vcombine.low %v504_v18, %v506_v20  ;;  %vm229_vm1 = vcmask 7168  }
  0x4b   : > { %v524_v33 = vcombine.low %v505_v19, %v507_v21  ;;  %v591_v34 = vrot.slane %v577_v23, %v1773_v11  ;;  %v607_v37 = vrot.slane %v593_v24, %v1773_v11  ;;  %v1899_v39 = vrot.slane %v576_v25, %v1773_v11 }
  0x4c   : > { %v1905_v43 = vrot.slane %v509_v29, %v1773_v11  ;;  %vm463_vm2 = vcmask 130048   ;;  %vm465_vm3 = vcmask 261120   ;;  %vm467_vm4 = vcmask 392192  }
  0x4d   : > { %v625_v56 = vcombine.high %v591_v34, %v607_v37  ;;  %vm469_vm5 = vcmask 523264   ;;  %vm471_vm6 = vcmask 654336   ;;  %vm475_vm7 = vcmask 916480  }
  0x4e   : > { %1057 = vrot.lane.b32.xlu0 %v984_v41, %s1625_s4  ;;  %1061 = vrot.lane.b32.xlu1 %v967_v42, %s1626_s6  ;;  %v1902_v42 = vrot.slane %v592_v28, %v1773_v11  ;;  %vm473_vm8 = vcmask 785408   ;;  %vm1144_vm9 = vcmask 1043456   ;;  %vm1160_vm10 = vcmask 293888  }
  0x4f   : > { %v1957_v2 = vrot.slane %v625_v56, %v1797_v22 }
  0x52   : > { %1093 = vrot.lane.b32.xlu0 %v1053_v46, %s1627_s7  ;;  %1065 = vrot.lane.b32.xlu1 %v985_v47, %s1627_s7  ;;  %v516_v46 = vrot.slane %v508_v32, %v1773_v11 }
  0x56   : > { %1097 = vrot.lane.b32.xlu0 %v1044_v48, %s1628_s8  ;;  %1101 = vrot.lane.b32.xlu1 %v1054_v49, %s1629_s17  ;;  %v532_v49 = vrot.slane %v524_v33, %v1773_v11 }
  0x58   : > { %v540_v60 = vcombine.low %v516_v46, %v532_v49  ;;  %v541_v21 = vcombine.high %v516_v46, %v532_v49 }
  0x5a   : > { %1069 = vrot.lane.b32.xlu0 %v976_v52, %s1628_s8  ;;  %1105 = vrot.lane.b32.xlu1 %v1859_v53, %s1630_s19 }
  0x5e   : > { %1073 = vrot.lane.b32.xlu0 %v986_v54, %s1629_s17 }
  0xac   : > { %v210_v62 = vpop.permute.xlu1 %209  ;;  %v206_v63 = vpop.permute.xlu0 %205 }
  0xb0   : > { %v212_v5 = vpop.permute.xlu1 %211  ;;  %v208_v6 = vpop.permute.xlu0 %207 }
  0xb1   : > { %v1917_v47 = vsel %vm229_vm1, %v1771_v10, %v212_v5  ;;  %v1921_v48 = vsel %vm229_vm1, %v1779_v13, %v208_v6  ;;  %v1934_v10 = vsel %vm229_vm1, %v1767_v8, %v210_v62  ;;  %v609_v8 = vcombine.high %v1899_v39, %v1902_v42 }
  0xb2   : > { %v624_v5 = vcombine.low %v591_v34, %v607_v37  ;;  %v250_v49 = vrot.slane %v1934_v10, 7 }
  0xb3   : > { %v623_v19 = vrot.slane %v609_v8, %v1797_v22 }
  0xb4   : > { %v216_v26 = vpop.permute.xlu1 %215  ;;  %v214_v27 = vpop.permute.xlu0 %213  ;;  %v1979_v32 = vrot.slane %v624_v5, %v1797_v22  ;;  %v268_v8 = vsel %vm246_vm0, %v1934_v10, %v250_v49 }
  0xb5   : > { %v1891_v35 = vsel %vm229_vm1, %v1781_v14, %v216_v26  ;;  %v1895_v36 = vsel %vm229_vm1, %v1783_v15, %v214_v27  ;;  %v1908_v14 = vrot.slane %v525_v31, %v1773_v11  ;;  %v1913_v15 = vsel %vm229_vm1, %v1769_v9, %v206_v63 }
  0xb6   : > { %v783_v50 = vcombine.high %v1921_v48, %v1891_v35  ;;  %v714_v51 = vcombine.low %v1913_v15, %v1895_v36  ;;  %v782_v13 = vcombine.low %v1921_v48, %v1891_v35  ;;  %v715_v57 = vcombine.high %v1913_v15, %v1895_v36 }
  0xb7   : > { %v557_v4 = vcombine.high %v1905_v43, %v1908_v14  ;;  %v1970_v26 = vrot.slane %v540_v60, %v1797_v22  ;;  %v556_v27 = vcombine.low %v1905_v43, %v1908_v14  ;;  %v555_v43 = vrot.slane %v541_v21, %v1797_v22 }
  0xb8   : > { %v220_v40 = vpop.permute.xlu1 %219  ;;  %v218_v41 = vpop.permute.xlu0 %217  ;;  %v797_v61 = vrot.slane %v783_v50, %v1773_v11  ;;  %v722_v62 = vrot.slane %v714_v51, %v1773_v11  ;;  %v1954_v1 = vrot.slane %v782_v13, %v1773_v11  ;;  %v729_v6 = vrot.slane %v715_v57, %v1773_v11 }
  0xb9   : > { %v237_v9 = vsel %vm229_vm1, %v1785_v16, %v220_v40  ;;  %v236_v52 = vsel %vm229_vm1, %v1787_v17, %v218_v41  ;;  %v1976_v31 = vrot.slane %v557_v4, %v1797_v22  ;;  %v247_v50 = vrot.slane %v1913_v15, 7 }
  0xba   : > { %v798_v54 = vcombine.low %v1917_v47, %v237_v9  ;;  %v799_v58 = vcombine.high %v1917_v47, %v237_v9  ;;  %v730_v16 = vcombine.low %v1934_v10, %v236_v52  ;;  %v731_v59 = vcombine.high %v1934_v10, %v236_v52 }
  0xbb   : > { %v257_v28 = vrot.slane %v237_v9, 7  ;;  %v256_v33 = vrot.slane %v236_v52, 7  ;;  %v572_v51 = vcombine.high %v1970_v26, %v1622_v3  ;;  %v608_v9 = vcombine.low %v1899_v39, %v1902_v42 }
  0xbc   : > { %v1945_v17 = vrot.slane %v798_v54, %v1773_v11  ;;  %v813_v63 = vrot.slane %v799_v58, %v1773_v11  ;;  %v738_v0 = vrot.slane %v730_v16, %v1773_v11  ;;  %v745_v7 = vrot.slane %v731_v59, %v1773_v11  ;;  %v1086_v44 = vpop.permute.xlu0 %1085  ;;  %v1090_v45 = vpop.permute.xlu1 %1089 }
  0xbd   : > { %v251_v13 = vrot.slane %v1917_v47, 7  ;;  %v248_v54 = vrot.slane %v1921_v48, 7  ;;  %v254_v56 = vrot.slane %v1891_v35, 7  ;;  %v253_v57 = vrot.slane %v1895_v36, 7 }
  0xbe   : > { %v746_v12 = vcombine.low %v722_v62, %v738_v0  ;;  %v831_v18 = vcombine.high %v797_v61, %v813_v63  ;;  %v815_v20 = vcombine.high %v1954_v1, %v1945_v17  ;;  %v747_v23 = vcombine.high %v722_v62, %v738_v0 }
  0xbf   : > { %v763_v25 = vcombine.high %v729_v6, %v745_v7  ;;  %v830_v46 = vcombine.low %v797_v61, %v813_v63  ;;  %v258_v58 = vsel %vm246_vm0, %v256_v33, %v257_v28  ;;  %v270_v16 = vsel %vm246_vm0, %v236_v52, %v256_v33 }
  0xc0   : > { %v1967_v24 = vrot.slane %v831_v18, %v1797_v22  ;;  %v829_v29 = vrot.slane %v815_v20, %v1797_v22  ;;  %v1987_v40 = vrot.slane %v746_v12, %v1797_v22  ;;  %v761_v14 = vrot.slane %v747_v23, %v1797_v22 }
  0xc1   : > { %v1984_v37 = vrot.slane %v763_v25, %v1797_v22  ;;  %v814_v42 = vcombine.low %v1954_v1, %v1945_v17  ;;  %v838_v35 = vrot.slane %v830_v46, %v1797_v22  ;;  %v762_v48 = vcombine.low %v729_v6, %v745_v7 }
  0xc2   : > { %v1433_v34 = vpack.i.bf16 %v1967_v24, %v1957_v2  ;;  %v1413_v41 = vpack.i.bf16 %v829_v29, %v623_v19  ;;  %v778_v39 = vcombine.high %v1987_v40, %v1622_v3  ;;  %v1418_v47 = vpack.i.bf16 %v761_v14, %v555_v43 }
  0xc3   : > { %v1438_v59 = vpack.i.bf16 %v1984_v37, %v1976_v31  ;;  %v564_v52 = vrot.slane %v556_v27, %v1797_v22  ;;  %v641_v60 = vcombine.high %v623_v19, %v1622_v3  ;;  %v2018_v61 = vrot.slane %v608_v9, %v1797_v22 }
  0xc4   : > { %1434 = vrot.lane.b32.xlu1 %v1433_v34, %s1630_s19  ;;  %1414 = vrot.lane.b32.xlu0 %v1413_v41, %s1626_s6  ;;  %v267_v62 = vsel %vm246_vm0, %v1913_v15, %v247_v50  ;;  %v252_v17 = vsel %vm246_vm0, %v250_v49, %v251_v13  ;;  %v255_v63 = vsel %vm246_vm0, %v253_v57, %v254_v56 }
  0xc5   : > { %v269_v0 = vsel %vm246_vm0, %v1895_v36, %v253_v57  ;;  %v288_v10 = vcombine.high %v268_v8, %v270_v16  ;;  %v356_v1 = vcombine.high %v252_v17, %v258_v58  ;;  %v1448_v4 = vpack.i.bf16 %v778_v39, %v572_v51 }
  0xc6   : > { %v847_v5 = vcombine.high %v829_v29, %v1622_v3  ;;  %v249_v6 = vsel %vm246_vm0, %v247_v50, %v248_v54  ;;  %v1423_v7 = vpack.i.bf16 %v838_v35, %v1979_v32  ;;  %v770_v15 = vrot.slane %v762_v48, %v1797_v22 }
  0xc7   : > { %v2032_v12 = vrot.slane %v814_v42, %v1797_v22  ;;  %v272_v18 = vcombine.high %v267_v62, %v269_v0  ;;  %v340_v19 = vcombine.high %v249_v6, %v255_v63  ;;  %v287_v36 = vcombine.low %v268_v8, %v270_v16 }
  0xc8   : > { %1439 = vrot.lane.b32.xlu1 %v1438_v59, %s1630_s19  ;;  %1419 = vrot.lane.b32.xlu0 %v1418_v47, %s1626_s6  ;;  %v355_v20 = vcombine.low %v252_v17, %v258_v58  ;;  %v573_v21 = vcombine.high %v555_v43, %v1622_v3  ;;  %v302_v23 = vrot.slane %v288_v10, %v1773_v11 }
  0xc9   : > { %v1453_v25 = vpack.i.bf16 %v847_v5, %v641_v60  ;;  %v779_v27 = vcombine.high %v761_v14, %v1622_v3  ;;  %v370_v28 = vrot.slane %v356_v1, %v1773_v11  ;;  %v1428_v29 = vpack.i.bf16 %v770_v15, %v564_v52 }
  0xca   : > { %v640_v33 = vcombine.high %v2018_v61, %v1622_v3  ;;  %v846_v34 = vcombine.high %v2032_v12, %v1622_v3  ;;  %v271_v41 = vcombine.low %v267_v62, %v269_v0  ;;  %v286_v46 = vrot.slane %v272_v18, %v1773_v11 }
  0xcb   : > { %v339_v49 = vcombine.low %v249_v6, %v255_v63  ;;  %v354_v43 = vrot.slane %v340_v19, %v1773_v11  ;;  %v295_v50 = vrot.slane %v287_v36, %v1773_v11  ;;  %v642_v14 = vcombine.high %v1979_v32, %v1622_v3 }
  0xcc   : > { %1449 = vrot.lane.b32.xlu1 %v1448_v4, %s1625_s4  ;;  %1424 = vrot.lane.b32.xlu0 %v1423_v7, %s1628_s8  ;;  %v848_v51 = vcombine.high %v838_v35, %v1622_v3  ;;  %v1458_v9 = vpack.i.bf16 %v779_v27, %v573_v21  ;;  %v319_v13 = vcombine.low %v286_v46, %v302_v23 }
  0xcd   : > { %v387_v54 = vcombine.low %v354_v43, %v370_v28  ;;  %v363_v56 = vrot.slane %v355_v20, %v1773_v11  ;;  %v1443_v57 = vpack.i.bf16 %v846_v34, %v640_v33  ;;  %v574_v58 = vcombine.high %v564_v52, %v1622_v3 }
  0xce   : > { %v780_v16 = vcombine.high %v770_v15, %v1622_v3  ;;  %v279_v59 = vrot.slane %v271_v41, %v1773_v11  ;;  %v347_v39 = vrot.slane %v339_v49, %v1773_v11  ;;  %v1463_v32 = vpack.i.bf16 %v848_v51, %v642_v14 }
  0xcf   : > { %v320_v42 = vcombine.high %v286_v46, %v302_v23  ;;  %v388_v47 = vcombine.high %v354_v43, %v370_v28  ;;  %v327_v35 = vrot.slane %v319_v13, %v1797_v22  ;;  %v395_v48 = vrot.slane %v387_v54, %v1797_v22 }
  0xd0   : > { %1454 = vrot.lane.b32.xlu1 %v1453_v25, %s1627_s7  ;;  %1429 = vrot.lane.b32.xlu0 %v1428_v29, %s1628_s8  ;;  %v303_v8 = vcombine.low %v279_v59, %v295_v50  ;;  %v371_v60 = vcombine.low %v347_v39, %v363_v56  ;;  %v1468_v52 = vpack.i.bf16 %v780_v16, %v574_v58 }
  0xd1   : > { %v643_v62 = vcombine.high %v1957_v2, %v1622_v3  ;;  %v849_v17 = vcombine.high %v1967_v24, %v1622_v3  ;;  %v334_v11 = vrot.slane %v320_v42, %v1797_v22  ;;  %v402_v63 = vrot.slane %v388_v47, %v1797_v22 }
  0xd2   : > { %v304_v0 = vcombine.high %v279_v59, %v295_v50  ;;  %v1488_v10 = vpack.i.bf16 %v327_v35, %v395_v48  ;;  %v2070_v1 = vrot.slane %v303_v8, %v1797_v22  ;;  %v2073_v4 = vrot.slane %v371_v60, %v1797_v22 }
  0xd3   : > { %v372_v2 = vcombine.high %v347_v39, %v363_v56  ;;  %v1473_v5 = vpack.i.bf16 %v849_v17, %v643_v62  ;;  %v575_v24 = vcombine.high %v1976_v31, %v1622_v3  ;;  %v781_v6 = vcombine.high %v1984_v37, %v1622_v3 }
  0xd4   : > { %1459 = vrot.lane.b32.xlu1 %v1458_v9, %s1627_s7  ;;  %1444 = vrot.lane.b32.xlu0 %v1443_v57, %s1625_s4  ;;  %v1493_v7 = vpack.i.bf16 %v334_v11, %v402_v63  ;;  %v335_v15 = vcombine.high %v2070_v1, %v1622_v3  ;;  %v403_v18 = vcombine.high %v2073_v4, %v1622_v3  ;;  %v1632_v50 = vmov 0  }
  0xd5   : > { %v318_v19 = vrot.slane %v304_v0, %v1797_v22  ;;  %v386_v36 = vrot.slane %v372_v2, %v1797_v22  ;;  %v1478_v31 = vpack.i.bf16 %v781_v6, %v575_v24  ;;  %v337_v25 = vcombine.high %v327_v35, %v1622_v3  ;;  %1519 = vset.pattern.permute.xlu0 %v1632_v50 }
  0xd6   : > { %v1498_v37 = vpack.i.bf16 %v335_v15, %v403_v18  ;;  %v405_v27 = vcombine.high %v395_v48, %v1622_v3  ;;  %v338_v29 = vcombine.high %v334_v11, %v1622_v3  ;;  %v406_v33 = vcombine.high %v402_v63, %v1622_v3  ;;  %1518 = vset.pattern.permute.xlu1 %v1632_v50 }
  0xd7   : > { %v336_v20 = vcombine.high %v318_v19, %v1622_v3  ;;  %v404_v21 = vcombine.high %v386_v36, %v1622_v3  ;;  %v1483_v23 = vpack.i.bf16 %v318_v19, %v386_v36  ;;  %v983_v41 = vrot.slane %v969_v55, %v1797_v22  ;;  %v1154_v22 = vld [vmem:[%s2279_s2] sm:$0xff]  ;;  %v1058_v55 = vpop.permute.xlu0 %1057 }
  0xd8   : > { %1464 = vrot.lane.b32.xlu1 %v1463_v32, %s1629_s17  ;;  %1469 = vrot.lane.b32.xlu0 %v1468_v52, %s1629_s17  ;;  %v1508_v34 = vpack.i.bf16 %v337_v25, %v405_v27  ;;  %v1513_v46 = vpack.i.bf16 %v338_v29, %v406_v33  ;;  %v1055_v49 = vcombine.high %v1859_v53, %v1622_v3  ;;  %v1062_v53 = vpop.permute.xlu1 %1061 }
  0xd9   : > { %v1503_v28 = vpack.i.bf16 %v336_v20, %v404_v21  ;;  %v987_v43 = vcombine.high %v983_v41, %v1622_v3  ;;  %v1119_v35 = vsel %vm463_vm2, %v1816_v30, %v1086_v44  ;;  %v1112_v60 = vsel %vm463_vm2, %v1828_v38, %v1058_v55 }
  0xda   : > { %v1120_v8 = vsel %vm465_vm3, %v1119_v35, %v1090_v45  ;;  %v1113_v24 = vsel %vm465_vm3, %v1112_v60, %v1062_v53 }
  0xdb   : > { %v1094_v14 = vpop.permute.xlu0 %1093 }
  0xdc   : > { %1489 = vrot.lane.b32.xlu1 %v1488_v10, %s1628_s8  ;;  %1474 = vrot.lane.b32.xlu0 %v1473_v5, %s1631_s20  ;;  %v1066_v51 = vpop.permute.xlu1 %1065  ;;  %v1121_v6 = vsel %vm467_vm4, %v1120_v8, %v1094_v14 }
  0xdf   : > { %v1098_v9 = vpop.permute.xlu0 %1097 }
  0xe0   : > { %1494 = vrot.lane.b32.xlu1 %v1493_v7, %s1630_s19  ;;  %1479 = vrot.lane.b32.xlu0 %v1478_v31, %s1631_s20  ;;  %v2113_v3 = vpop.permute.xlu1 %1101 }
  0xe3   : > { %v2115_v13 = vpop.permute.xlu0 %1069 }
  0xe4   : > { %1499 = vrot.lane.b32.xlu1 %v1498_v37, %s1625_s4  ;;  %1484 = vrot.lane.b32.xlu0 %v1483_v23, %s1626_s6  ;;  %v2117_v54 = vpop.permute.xlu1 %1105  ;;  %v1114_v37 = vsel %vm467_vm4, %v1113_v24, %v1066_v51  ;;  %s2233_s4 = scalar_lea.hbm %s2280_s3, %s1344_s30  ;;  %s1242_s6 = scalar_lea.sflag [#allocation4], %s1758_s5 }
  0xe5   : > { %v2164_v14 = vsel %vm469_vm5, %v1114_v37, %v2115_v13 }
  0xe7   : > { %v2119_v56 = vpop.permute.xlu0 %1073 }
  0xe8   : > { %1504 = vrot.lane.b32.xlu1 %v1503_v28, %s1627_s7  ;;  %1509 = vrot.lane.b32.xlu0 %v1508_v34, %s1629_s17  ;;  %s1633_s7 = smov [#allocation5]  }
  0xe9   : > { %s1554_s8 = sshll.u32 %s1633_s7, 4  ;;  %s1555_s8 = int_to_ptr.vmem [resolvable:$false] %s1554_s8 }
  0xea   : > { %s1556_s17 = scalar_lea.vmem %s1555_s8, 512  ;;  %p1557_p8 = scmp.lt.s32.totalorder %s2235_s10, %s1555_s8 }
  0xeb   : > { %p1558_p10 = scmp.lt.s32.totalorder %s1556_s17, %s1550_s16 }
  0xec   : > { %1514 = vrot.lane.b32.xlu1 %v1513_v46, %s1631_s20  ;;  %1077 = vrot.lane.b32.xlu0 %v983_v41, %s1630_s19 }
  0xed   : > { %p1559_p0 = por %p1558_p10, %p1557_p8 }
  0xef   : > { %p1560_p2 = pnand %p1559_p0, %p1553_p13 }
  0xf0   : > { %1109 = vrot.lane.b32.xlu1 %v1055_v49, %s1631_s20  ;;  %1081 = vrot.lane.b32.xlu0 %v987_v43, %s1631_s20 }
  0xf4   : > { %1157 = vperm.xlu1 %1518, %v1154_v22  }
 0x136   : > { %v2121_v57 = vpop.permute.xlu1 %1434  ;;  %v1415_v58 = vpop.permute.xlu0 %1414 }
 0x137   : > { %v1417_v0 = vunpack.i.h.bf16 %v1415_v58  ;;  %v1416_v10 = vunpack.i.l.bf16 %v1415_v58 }
 0x13a   : > { %v2123_v16 = vpop.permute.xlu1 %1439  ;;  %v1420_v59 = vpop.permute.xlu0 %1419 }
 0x13b   : > { %v1422_v20 = vunpack.i.h.bf16 %v1420_v59  ;;  %v1421_v21 = vunpack.i.l.bf16 %v1420_v59  ;;  %v1437_v59 = vunpack.i.h.bf16 %v2121_v57 }
 0x13e   : > { %v1450_v39 = vpop.permute.xlu1 %1449  ;;  %v1425_v32 = vpop.permute.xlu0 %1424 }
 0x13f   : > { %v1452_v62 = vunpack.i.h.bf16 %v1450_v39  ;;  %v1451_v17 = vunpack.i.l.bf16 %v1450_v39  ;;  %v1427_v28 = vunpack.i.h.bf16 %v1425_v32  ;;  %v1426_v29 = vunpack.i.l.bf16 %v1425_v32 }
 0x140   : > { %v1436_v39 = vunpack.i.l.bf16 %v2121_v57  ;;  %v1442_v32 = vunpack.i.h.bf16 %v2123_v16 }
 0x141   : > { %v906_v7 = vsel %vm463_vm2, %v1987_v40, %v1452_v62  ;;  %v700_v15 = vsel %vm463_vm2, %v1970_v26, %v1451_v17  ;;  %v1122_v40 = vsel %vm469_vm5, %v1121_v6, %v1098_v9 }
 0x142   : > { %v1455_v42 = vpop.permute.xlu1 %1454  ;;  %v2125_v47 = vpop.permute.xlu0 %1429  ;;  %v701_v33 = vsel %vm465_vm3, %v700_v15, %v1421_v21  ;;  %v907_v34 = vsel %vm465_vm3, %v906_v7, %v1422_v20  ;;  %v2160_v53 = vsel %vm471_vm6, %v1122_v40, %v2113_v3 }
 0x143   : > { %v1457_v19 = vunpack.i.h.bf16 %v1455_v42  ;;  %v1456_v36 = vunpack.i.l.bf16 %v1455_v42  ;;  %v1432_v51 = vunpack.i.h.bf16 %v2125_v47  ;;  %v1431_v9 = vunpack.i.l.bf16 %v2125_v47 }
 0x144   : > { %v1441_v42 = vunpack.i.l.bf16 %v2123_v16 }
 0x146   : > { %v1460_v48 = vpop.permute.xlu1 %1459  ;;  %v1445_v52 = vpop.permute.xlu0 %1444 }
 0x147   : > { %v1447_v11 = vunpack.i.h.bf16 %v1445_v52  ;;  %v1446_v63 = vunpack.i.l.bf16 %v1445_v52  ;;  %v1461_v31 = vunpack.i.l.bf16 %v1460_v48 }
 0x149   : > { %v913_v2 = vsel %vm463_vm2, %v2032_v12, %v1447_v11  ;;  %v707_v30 = vsel %vm463_vm2, %v2018_v61, %v1446_v63  ;;  %v1462_v61 = vunpack.i.h.bf16 %v1460_v48  ;;  %v702_v46 = vsel %vm467_vm4, %v701_v33, %v1461_v31 }
 0x14a   : > { %v1465_v5 = vpop.permute.xlu1 %1464  ;;  %v1470_v38 = vpop.permute.xlu0 %1469  ;;  %v914_v18 = vsel %vm465_vm3, %v913_v2, %v1417_v0  ;;  %v708_v12 = vsel %vm465_vm3, %v707_v30, %v1416_v10  ;;  %v703_v13 = vsel %vm469_vm5, %v702_v46, %v1431_v9  ;;  %v1124_v9 = vsel %vm473_vm8, %v2160_v53, %v2117_v54 }
 0x14b   : > { %v709_v25 = vsel %vm467_vm4, %v708_v12, %v1456_v36  ;;  %v915_v26 = vsel %vm467_vm4, %v914_v18, %v1457_v19  ;;  %v908_v41 = vsel %vm467_vm4, %v907_v34, %v1462_v61  ;;  %v1467_v49 = vunpack.i.h.bf16 %v1465_v5 }
 0x14c   : > { %v1466_v43 = vunpack.i.l.bf16 %v1465_v5  ;;  %v710_v50 = vsel %vm469_vm5, %v709_v25, %v1426_v29  ;;  %v916_v22 = vsel %vm469_vm5, %v915_v26, %v1427_v28  ;;  %v1472_v44 = vunpack.i.h.bf16 %v1470_v38 }
 0x14d   : > { %v1471_v45 = vunpack.i.l.bf16 %v1470_v38  ;;  %v917_v35 = vsel %vm471_vm6, %v916_v22, %v1467_v49  ;;  %v909_v48 = vsel %vm469_vm5, %v908_v41, %v1432_v51 }
 0x14e   : > { %v2145_v23 = vpop.permute.xlu1 %1489  ;;  %v1475_v27 = vpop.permute.xlu0 %1474  ;;  %v711_v3 = vsel %vm471_vm6, %v710_v50, %v1466_v43  ;;  %v910_v8 = vsel %vm471_vm6, %v909_v48, %v1472_v44  ;;  %v918_v5 = vsel %vm473_vm8, %v917_v35, %v1437_v59 }
 0x14f   : > { %v704_v47 = vsel %vm471_vm6, %v703_v13, %v1471_v45  ;;  %v1477_v60 = vunpack.i.h.bf16 %v1475_v27  ;;  %v1476_v52 = vunpack.i.l.bf16 %v1475_v27  ;;  %v1492_v57 = vunpack.i.h.bf16 %v2145_v23 }
 0x150   : > { %v1491_v0 = vunpack.i.l.bf16 %v2145_v23  ;;  %v712_v38 = vsel %vm473_vm8, %v711_v3, %v1436_v39  ;;  %v911_v15 = vsel %vm473_vm8, %v910_v8, %v1442_v32  ;;  %v705_v19 = vsel %vm473_vm8, %v704_v47, %v1441_v42 }
 0x151   : > { %v919_v7 = vsel %vm475_vm7, %v918_v5, %v1477_v60  ;;  %v713_v12 = vsel %vm475_vm7, %v712_v38, %v1476_v52 }
 0x152   : > { %v2156_v55 = vpop.permute.xlu1 %1494  ;;  %v1480_v58 = vpop.permute.xlu0 %1479  ;;  %v1135_v34 = vrot.slane %v919_v7, 4  ;;  %v1129_v45 = vrot.slane %v713_v12, 4 }
 0x153   : > { %v1482_v17 = vunpack.i.h.bf16 %v1480_v58  ;;  %v1481_v10 = vunpack.i.l.bf16 %v1480_v58  ;;  %v1497_v36 = vunpack.i.h.bf16 %v2156_v55  ;;  %v1116_v58 = vsel %vm471_vm6, %v2164_v14, %v2119_v56 }
 0x154   : > { %v1148_v3 = vsel %vm1144_vm9, %v713_v12, %v1135_v34 }
 0x155   : > { %v912_v61 = vsel %vm475_vm7, %v911_v15, %v1482_v17  ;;  %v706_v23 = vsel %vm475_vm7, %v705_v19, %v1481_v10 }
 0x156   : > { %v1500_v62 = vpop.permute.xlu1 %1499  ;;  %v1485_v63 = vpop.permute.xlu0 %1484  ;;  %v1134_v41 = vrot.slane %v912_v61, 4  ;;  %v1128_v51 = vrot.slane %v706_v23, 4 }
 0x157   : > { %v1502_v11 = vunpack.i.h.bf16 %v1500_v62  ;;  %v1501_v16 = vunpack.i.l.bf16 %v1500_v62  ;;  %v1487_v2 = vunpack.i.h.bf16 %v1485_v63  ;;  %v1486_v30 = vunpack.i.l.bf16 %v1485_v63  ;;  %v1153_v63 = vld [vmem:[%s2278_s1] sm:$0xff] }
 0x158   : > { %v1147_v13 = vsel %vm1144_vm9, %v706_v23, %v1134_v41 }
 0x159   : > { %v464_v24 = vsel %vm463_vm2, %v2070_v1, %v1502_v11  ;;  %v477_v6 = vsel %vm463_vm2, %v2073_v4, %v1501_v16  ;;  %v1496_v4 = vunpack.i.l.bf16 %v2156_v55 }
 0x15a   : > { %v1505_v18 = vpop.permute.xlu1 %1504  ;;  %v1510_v37 = vpop.permute.xlu0 %1509  ;;  %v466_v20 = vsel %vm465_vm3, %v464_v24, %v1487_v2  ;;  %v478_v21 = vsel %vm465_vm3, %v477_v6, %v1486_v30 }
 0x15b   : > { %v1507_v31 = vunpack.i.h.bf16 %v1505_v18  ;;  %v1506_v1 = vunpack.i.l.bf16 %v1505_v18  ;;  %v1512_v26 = vunpack.i.h.bf16 %v1510_v37  ;;  %v1511_v27 = vunpack.i.l.bf16 %v1510_v37 }
 0x15d   : > { %v468_v40 = vsel %vm467_vm4, %v466_v20, %v1507_v31  ;;  %v479_v25 = vsel %vm467_vm4, %v478_v21, %v1506_v1 }
 0x15e   : > { %v470_v28 = vsel %vm469_vm5, %v468_v40, %v1492_v57  ;;  %v480_v29 = vsel %vm469_vm5, %v479_v25, %v1491_v0  ;;  %v1515_v33 = vpop.permute.xlu1 %1514  ;;  %v1078_v22 = vpop.permute.xlu0 %1077 }
 0x15f   : > { %v472_v46 = vsel %vm471_vm6, %v470_v28, %v1512_v26  ;;  %v481_v49 = vsel %vm471_vm6, %v480_v29, %v1511_v27  ;;  %v1517_v43 = vunpack.i.h.bf16 %v1515_v33  ;;  %v1516_v50 = vunpack.i.l.bf16 %v1515_v33 }
 0x160   : > { %v482_v44 = vsel %vm473_vm8, %v481_v49, %v1496_v4  ;;  %v474_v55 = vsel %vm473_vm8, %v472_v46, %v1497_v36  ;;  %v1117_v48 = vsel %vm473_vm8, %v1116_v58, %v1078_v22 }
 0x161   : > { %v483_v59 = vsel %vm475_vm7, %v482_v44, %v1516_v50  ;;  %v476_v39 = vsel %vm475_vm7, %v474_v55, %v1517_v43 }
 0x162   : > { %v1110_v32 = vpop.permute.xlu1 %1109  ;;  %v1146_v42 = vsel %vm1144_vm9, %v483_v59, %v1129_v45  ;;  %v1145_v35 = vsel %vm1144_vm9, %v476_v39, %v1128_v51  ;;  %v1082_v53 = vpop.permute.xlu0 %1081 }
 0x163   : > { %v1125_v54 = vsel %vm475_vm7, %v1124_v9, %v1110_v32  ;;  %v1345_v8 = vpack.c.bf16 %v1148_v3, %v1146_v42  ;;  %v1347_v56 = vpack.c.bf16 %v1147_v13, %v1145_v35  ;;  %v1118_v47 = vsel %vm475_vm7, %v1117_v48, %v1082_v53 }
 0x164   : > { %v1141_v14 = vrot.slane %v1125_v54, 4  ;;  %v1140_v60 = vrot.slane %v1118_v47, 4 }
 0x165   : > { %1346 = vmatprep.subr.bf16.mxu0 %v1345_v8 }
 0x166   : > { %v1150_v52 = vsel %vm1144_vm9, %v1125_v54, %v1141_v14  ;;  %1348 = vmatpush1.bf16.msra.mxu0 %v1347_v56  ;;  %v1152_v62 = vsel %vm1144_vm9, %v919_v7, %v1141_v14  ;;  %v1149_v57 = vsel %vm1144_vm9, %v1118_v47, %v1140_v60  ;;  %v1151_v11 = vsel %vm1144_vm9, %v912_v61, %v1140_v60 }
 0x167   : > { %v1349_v17 = vpack.c.bf16 %v1152_v62, %v1150_v52  ;;  %v1351_v16 = vpack.c.bf16 %v1151_v11, %v1149_v57 }
 0x169   : > { %1350 = vmatprep.subr.bf16.mxu0 %v1349_v17 }
 0x16a   : > { %1352 = vmatpush1.bf16.msra.mxu0 %v1351_v16 }
 0x16b   : > { %1335 = vmatprep.subr.msk.mxu0 %vm1144_vm9, %v1125_v54 }
 0x16e   : > { %1336 = vmatpush1.msk.msra.mxu0 %vm1144_vm9, %v1118_v47 }
 0x16f   : > { %1337 = vmatmul.mubr.msk.f32.vlgmr.msra.gmra.mrb[0].mxu0 %vm1160_vm10, %v1153_v63 }
 0x173   : > { %v1158_v0 = vpop.permute.xlu1 %1157 }
 0x242   : > { %v1234_v10 = vpop.f32.mrb[0].mxu0 }
 0x243   : > { %v1235_v2 = vadd.f32 %v1234_v10, %v1158_v0  ;;  %v1236_v30 = vpop.f32.mrb[1].mxu0 }
 0x244   : > { %v1237_v5 = vadd.f32 %v1236_v30, %v1158_v0 }
 0x245   : > { %1239 = vst [vmem:[%s188_s9] sm:$0xff] %v1235_v2 }
 0x246   : > { %1240 = vst [vmem:[%s188_s9 + $0x8] sm:$0xff] %v1237_v5 }
 0x247   : > { %1563 = shalt.err (!%p1560_p2)
}
 0x248   : > { %s1564_s5 = scalar_lea.hbm %s2233_s4, 256  ;;  %s1568_s22 = scalar_lea.hbm %s2280_s3, 512 }
 0x249   : > { %p1565_p4 = scmp.ne.s32.totalorder %s2233_s4, %s1564_s5  ;;  %p1569_p9 = scmp.lt.u32.totalorder %s2233_s4, %s2280_s3 }
 0x24a   : > { %p1570_p1 = scmp.lt.u32.totalorder %s1568_s22, %s1564_s5  ;;  %p1572_p6 = scmp.lt.u32.totalorder %s1564_s5, %s2233_s4 }
 0x24b   : > { %p1566_p5 = pnand %p1565_p4, %p2287_p11 }
 0x24c   : > { %p1571_p3 = por %p1570_p1, %p1569_p9 }
 0x24d   : > { %p1567_p7 = pneg %p1566_p5 }
 0x24e   : > { %p1573_p12 = por %p1572_p6, %p1571_p3 }
 0x250   : > { %p1574_p13 = pnand %p1573_p12, %p1567_p7 }
 0x252   : > { %1577 = shalt.err (!%p1574_p13)
}
 0x253   : > { %1355 = dma.vmem_to_hbm [thread:$0]  (%p2287_p11), %s2235_s10, 256, %s2233_s4, %s1242_s6  }
 0x254 PF: > { %s1268_s28 = sand.u32 1, %s1604_s12   ;;  %p2288_p8 = scmp.ne.s32.totalorder %s2285_s25, 0 }
 0x255   : > { %p2289_p10 = scmp.ge.s32.totalorder %s1616_s15, 2  ;;  %s1269_s29 = scalar_lea.sflag [#allocation4], %s1268_s28 }
 0x257   : > { %p1362_p0 = pnand %p2289_p10, %p2288_p8 }
 0x259   : > { %1599 = dma.done.wait (!%p1362_p0), %s1269_s29, 256  }
 0x25a   : > { %1601 = vsyncadd (!%p1362_p0), %s1269_s29, 4294967040  ;;  %p16_p2 = scmp.ge.s32.totalorder %s1679_s18, 4   ;;  %s2290_s12 = smov %s1608_s13 }
 0x25b   : > { %s2291_s13 = smov %s1612_s14  ;;  %s2292_s14 = smov %s1691_s21 }
 0x25c   : > { %s2293_s15 = smov %s1679_s18  ;;  %18 = sbr.rel (!%p16_p2) target bundleno = 5 (0x5), region = 77 }
 0x263   :  { %1274 = vsyncpa [#allocation3], 1 }
 0x264   :  { %1276 = vsyncpa [#allocation3 + $0x1], 1 }
 0x265   :  { %1277 = vsyncpa [#allocation4], 1 }
 0x266   :  { %1279 = vsyncpa [#allocation4 + $0x1], 1 }

</bundles_post_ra>
